<compile_context>
chip_gen: v7x
topology: tpu7x:2x2x1
jax: 0.10.0
libtpu: 0.0.40
codegen_flags: <defaults>
</compile_context>

<pallas_src>
import functools

import jax
import jax.numpy as jnp
from jax import lax
from jax.experimental import pallas as pl
from jax.experimental.pallas import tpu as pltpu

_LANE = 128
_SUBLANE = 8


def _round_up(n, m):
    return ((n + m - 1) // m) * m


def _make_kernel(num_classes):
    """Fused Linear->ReLU->Linear->ReLU->Linear->Softmax over one batch tile."""

    def kernel(x_ref, w1_ref, b1_ref, w2_ref, b2_ref, w3_ref, b3_ref, o_ref):
        # Layer 1: Linear + bias + ReLU (all f32; padded hidden lanes stay 0).
        h = jnp.dot(x_ref[...], w1_ref[...], preferred_element_type=jnp.float32)
        h = jnp.maximum(h + b1_ref[...], 0.0)
        # Layer 2: Linear + bias + ReLU.
        h = jnp.dot(h, w2_ref[...], preferred_element_type=jnp.float32)
        h = jnp.maximum(h + b2_ref[...], 0.0)
        # Head: Linear -> exact softmax over the real classes only.
        logits = jnp.dot(h, w3_ref[...], preferred_element_type=jnp.float32)
        logits = logits + b3_ref[...]                       # (TB, Cp) f32
        valid = lax.broadcasted_iota(jnp.int32, logits.shape, 1) < num_classes
        m = jnp.max(jnp.where(valid, logits, jnp.finfo(jnp.float32).min),
                    axis=-1, keepdims=True)
        # min(.,0) keeps exp() <= 1 everywhere (no overflow on masked lanes);
        # masked lanes contribute exactly 0 to the denominator.
        e = jnp.where(valid, jnp.exp(jnp.minimum(logits - m, 0.0)), 0.0)
        probs = e / jnp.sum(e, axis=-1, keepdims=True)
        # Compact store: only the real class lanes are written back.
        o_ref[...] = probs[:, :num_classes]

    return kernel


@functools.partial(jax.jit, static_argnames=("num_classes",))
def _forward(x, w1, b1, w2, b2, w3, b3, *, num_classes):
    B, F = x.shape
    H1p = w1.shape[1]
    H2p = w2.shape[1]
    Cp = w3.shape[1]

    # Batch tile: at least 8 rows (f32 sublane), at most 1024, and sized so
    # that large batches produce >=2 grid steps (both v7x TensorCores busy).
    TB = max(_SUBLANE, min(1024, _round_up(-(-B // 2), _SUBLANE)))
    grid = -(-B // TB)          # cdiv; last block may be partial (rows stripped)
    Bp = grid * TB

    out = pl.pallas_call(
        _make_kernel(num_classes),
        out_shape=jax.ShapeDtypeStruct((Bp, num_classes), jnp.float32),
        grid_spec=pl.GridSpec(
            grid=(grid,),
            in_specs=[
                pl.BlockSpec((TB, F), lambda i: (i, 0)),      # x streamed over batch
                pl.BlockSpec((F, H1p), lambda i: (0, 0)),     # weights stay VMEM-resident
                pl.BlockSpec((1, H1p), lambda i: (0, 0)),
                pl.BlockSpec((H1p, H2p), lambda i: (0, 0)),
                pl.BlockSpec((1, H2p), lambda i: (0, 0)),
                pl.BlockSpec((H2p, Cp), lambda i: (0, 0)),
                pl.BlockSpec((1, Cp), lambda i: (0, 0)),
            ],
            out_specs=pl.BlockSpec((TB, num_classes), lambda i: (i, 0)),
        ),
        compiler_params=pltpu.CompilerParams(
            dimension_semantics=("parallel",)),               # megacore sharding on v7x
    )(x, w1, b1, w2, b2, w3, b3)

    if Bp != B:
        out = out[:B]
    # .reshape(-1) matches the PyTorch module's flatten.
    return out.reshape(-1)


def prepare_params(params):
    """One-time padding of weights/biases to 128-lane multiples (f32).

    Returns (padded_params_dict, num_classes). Padded hidden units have zero
    weights/biases so they stay exactly 0 after ReLU; padded class lanes are
    excluded inside the kernel by an explicit mask.
    """
    w1, b1 = params["W1"], params["b1"]
    w2, b2 = params["W2"], params["b2"]
    w3, b3 = params["W3"], params["b3"]
    F, H1 = w1.shape
    H2, C = w2.shape[1], w3.shape[1]
    H1p, H2p, Cp = (_round_up(d, _LANE) for d in (H1, H2, C))
    f32 = jnp.float32
    padded = {
        "W1": jnp.zeros((F, H1p), f32).at[:, :H1].set(w1.astype(f32)),
        "b1": jnp.zeros((1, H1p), f32).at[:, :H1].set(b1.astype(f32)),
        "W2": jnp.zeros((H1p, H2p), f32).at[:H1, :H2].set(w2.astype(f32)),
        "b2": jnp.zeros((1, H2p), f32).at[:, :H2].set(b2.astype(f32)),
        "W3": jnp.zeros((H2p, Cp), f32).at[:H2, :C].set(w3.astype(f32)),
        "b3": jnp.zeros((1, Cp), f32).at[:, :C].set(b3.astype(f32)),
    }
    return padded, C


def ffnn_no_train_forward(x, padded_params, num_classes):
    """x: (B, in_features) f32. Returns softmax probabilities flattened to (B*C,)."""
    return _forward(
        x,
        padded_params["W1"], padded_params["b1"],
        padded_params["W2"], padded_params["b2"],
        padded_params["W3"], padded_params["b3"],
        num_classes=num_classes,
    )


def init_params(key, in_features, hidden_sizes, classes):
    """Deterministic synthetic parameters (checkpoint not available).

    Stored as (in, out) so the kernel computes x @ W + b, equivalent to
    PyTorch's x @ W.T + b."""
    # TODO(synk): real deployment loads weights from the .pt checkpoint; not possible in-script.
    params = {}
    dims = [in_features] + list(hidden_sizes) + [classes]
    names = [("W1", "b1"), ("W2", "b2"), ("W3", "b3")]
    for (wname, bname), (fan_in, fan_out) in zip(names, zip(dims[:-1], dims[1:])):
        key, kw, kb = jax.random.split(key, 3)
        bound = 1.0 / jnp.sqrt(fan_in)
        params[wname] = jax.random.uniform(
            kw, (fan_in, fan_out), jnp.float32, -bound, bound)
        params[bname] = jax.random.uniform(
            kb, (1, fan_out), jnp.float32, -bound, bound)
    return params


def _reference_forward(x, params):
    """Pure-JAX reference of the PyTorch module (eval mode)."""
    h = jnp.maximum(x @ params["W1"] + params["b1"], 0.0)
    h = jnp.maximum(h @ params["W2"] + params["b2"], 0.0)
    logits = h @ params["W3"] + params["b3"]
    return jax.nn.softmax(logits, axis=-1).reshape(-1)


if __name__ == "__main__":
    key = jax.random.PRNGKey(0)
    key, kx = jax.random.split(key)

    batch = 2
    in_features = 64
    hidden_sizes = (32, 16)   # n_layers = 2
    classes = 2

    x = jax.random.normal(kx, (batch, in_features), jnp.float32)
    params = init_params(key, in_features, hidden_sizes, classes)

    # Padding/cast of weights is done once and reused across calls.
    padded_params, num_classes = prepare_params(params)

    out = ffnn_no_train_forward(x, padded_params, num_classes)
    out = jax.block_until_ready(out)

    # Sanity: correct flattened shape, finite, rows sum to 1, matches reference.
    assert out.shape == (batch * classes,)
    probs = out.reshape(batch, classes)
    assert bool(jnp.all(jnp.isfinite(probs)))
    assert jnp.allclose(jnp.sum(probs, axis=-1), 1.0, atol=1e-3)
    ref = _reference_forward(x, params).reshape(batch, classes)
    assert jnp.allclose(probs, ref, atol=1e-2, rtol=1e-2)

    print("KERNEL_OK")
</pallas_src>

<mosaic_0001>
module attributes {stable_mosaic.version = 11 : i64} {
  func.func @kernel(%arg0: i32, %arg1: memref<8x64xf32, #tpu.memory_space<vmem>>, %arg2: memref<64x128xf32, #tpu.memory_space<vmem>>, %arg3: memref<1x128xf32, #tpu.memory_space<vmem>>, %arg4: memref<128x128xf32, #tpu.memory_space<vmem>>, %arg5: memref<1x128xf32, #tpu.memory_space<vmem>>, %arg6: memref<128x128xf32, #tpu.memory_space<vmem>>, %arg7: memref<1x128xf32, #tpu.memory_space<vmem>>, %arg8: memref<8x2xf32, #tpu.memory_space<vmem>>) attributes {dimension_semantics = [#tpu.dimension_semantics<parallel>], iteration_bounds = array<i64: 1>, scalar_prefetch = 0 : i64, scratch_operands = 0 : i64, tpu.core_type = #tpu.core_type<tc>, window_params = [{transform_indices = @transform_0, window_bounds = array<i64: 8, 64>}, {pipeline_mode = #tpu.pipeline_mode<synchronous>, transform_indices = @transform_1, window_bounds = array<i64: 64, 128>}, {pipeline_mode = #tpu.pipeline_mode<synchronous>, transform_indices = @transform_2, window_bounds = array<i64: 1, 128>}, {pipeline_mode = #tpu.pipeline_mode<synchronous>, transform_indices = @transform_3, window_bounds = array<i64: 128, 128>}, {pipeline_mode = #tpu.pipeline_mode<synchronous>, transform_indices = @transform_4, window_bounds = array<i64: 1, 128>}, {pipeline_mode = #tpu.pipeline_mode<synchronous>, transform_indices = @transform_5, window_bounds = array<i64: 128, 128>}, {pipeline_mode = #tpu.pipeline_mode<synchronous>, transform_indices = @transform_6, window_bounds = array<i64: 1, 128>}, {transform_indices = @transform_7, window_bounds = array<i64: 8, 2>}]} {
    %c0 = arith.constant 0 : index
    %c0_0 = arith.constant 0 : index
    %0 = vector.load %arg1[%c0, %c0_0] : memref<8x64xf32, #tpu.memory_space<vmem>>, vector<8x64xf32>
    %c0_1 = arith.constant 0 : index
    %c0_2 = arith.constant 0 : index
    %1 = vector.load %arg2[%c0_1, %c0_2] : memref<64x128xf32, #tpu.memory_space<vmem>>, vector<64x128xf32>
    %cst = arith.constant dense<0.000000e+00> : vector<8x128xf32>
    %2 = tpu.matmul %0, %1, %cst {dimension_numbers = #tpu.dot_dimension_numbers<[1], [0], [0], [1], [0, 0, 1, 1], [], []>} : vector<8x64xf32>, vector<64x128xf32>, vector<8x128xf32> -> vector<8x128xf32>
    %c0_3 = arith.constant 0 : index
    %c0_4 = arith.constant 0 : index
    %3 = vector.load %arg3[%c0_3, %c0_4] : memref<1x128xf32, #tpu.memory_space<vmem>>, vector<1x128xf32>
    %4 = vector.broadcast %3 : vector<1x128xf32> to vector<8x128xf32>
    %5 = arith.addf %2, %4 : vector<8x128xf32>
    %cst_5 = arith.constant 0.000000e+00 : f32
    %6 = vector.broadcast %cst_5 : f32 to vector<8x128xf32>
    %7 = arith.maximumf %5, %6 : vector<8x128xf32>
    %c0_6 = arith.constant 0 : index
    %c0_7 = arith.constant 0 : index
    %8 = vector.load %arg4[%c0_6, %c0_7] : memref<128x128xf32, #tpu.memory_space<vmem>>, vector<128x128xf32>
    %cst_8 = arith.constant dense<0.000000e+00> : vector<8x128xf32>
    %9 = tpu.matmul %7, %8, %cst_8 {dimension_numbers = #tpu.dot_dimension_numbers<[1], [0], [0], [1], [0, 0, 1, 1], [], []>} : vector<8x128xf32>, vector<128x128xf32>, vector<8x128xf32> -> vector<8x128xf32>
    %c0_9 = arith.constant 0 : index
    %c0_10 = arith.constant 0 : index
    %10 = vector.load %arg5[%c0_9, %c0_10] : memref<1x128xf32, #tpu.memory_space<vmem>>, vector<1x128xf32>
    %11 = vector.broadcast %10 : vector<1x128xf32> to vector<8x128xf32>
    %12 = arith.addf %9, %11 : vector<8x128xf32>
    %cst_11 = arith.constant 0.000000e+00 : f32
    %13 = vector.broadcast %cst_11 : f32 to vector<8x128xf32>
    %14 = arith.maximumf %12, %13 : vector<8x128xf32>
    %c0_12 = arith.constant 0 : index
    %c0_13 = arith.constant 0 : index
    %15 = vector.load %arg6[%c0_12, %c0_13] : memref<128x128xf32, #tpu.memory_space<vmem>>, vector<128x128xf32>
    %cst_14 = arith.constant dense<0.000000e+00> : vector<8x128xf32>
    %16 = tpu.matmul %14, %15, %cst_14 {dimension_numbers = #tpu.dot_dimension_numbers<[1], [0], [0], [1], [0, 0, 1, 1], [], []>} : vector<8x128xf32>, vector<128x128xf32>, vector<8x128xf32> -> vector<8x128xf32>
    %c0_15 = arith.constant 0 : index
    %c0_16 = arith.constant 0 : index
    %17 = vector.load %arg7[%c0_15, %c0_16] : memref<1x128xf32, #tpu.memory_space<vmem>>, vector<1x128xf32>
    %18 = vector.broadcast %17 : vector<1x128xf32> to vector<8x128xf32>
    %19 = arith.addf %16, %18 : vector<8x128xf32>
    %20 = tpu.iota {dimensions = array<i32: 1>} : vector<8x128xi32>
    %c2_i32 = arith.constant 2 : i32
    %21 = vector.broadcast %c2_i32 : i32 to vector<8x128xi32>
    %22 = arith.cmpi slt, %20, %21 : vector<8x128xi32>
    %cst_17 = arith.constant -3.40282347E+38 : f32
    %23 = vector.broadcast %cst_17 : f32 to vector<8x128xf32>
    %24 = arith.select %22, %19, %23 : vector<8x128xi1>, vector<8x128xf32>
    %cst_18 = arith.constant dense<0xFF800000> : vector<8xf32>
    %25 = vector.multi_reduction <maximumf>, %24, %cst_18 [1] : vector<8x128xf32> to vector<8xf32>
    %26 = vector.shape_cast %25 : vector<8xf32> to vector<8x1xf32>
    %27 = vector.broadcast %26 : vector<8x1xf32> to vector<8x128xf32>
    %28 = arith.subf %19, %27 : vector<8x128xf32>
    %cst_19 = arith.constant 0.000000e+00 : f32
    %29 = vector.broadcast %cst_19 : f32 to vector<8x128xf32>
    %30 = arith.minimumf %28, %29 : vector<8x128xf32>
    %31 = math.exp %30 : vector<8x128xf32>
    %cst_20 = arith.constant 0.000000e+00 : f32
    %32 = vector.broadcast %cst_20 : f32 to vector<8x128xf32>
    %33 = arith.select %22, %31, %32 : vector<8x128xi1>, vector<8x128xf32>
    %cst_21 = arith.constant dense<0.000000e+00> : vector<8xf32>
    %34 = vector.multi_reduction <add>, %33, %cst_21 [1] : vector<8x128xf32> to vector<8xf32>
    %35 = vector.shape_cast %34 : vector<8xf32> to vector<8x1xf32>
    %36 = vector.broadcast %35 : vector<8x1xf32> to vector<8x128xf32>
    %37 = arith.divf %33, %36 : vector<8x128xf32>
    %38 = vector.extract_strided_slice %37 {offsets = [0, 0], sizes = [8, 2], strides = [1, 1]} : vector<8x128xf32> to vector<8x2xf32>
    %c0_22 = arith.constant 0 : index
    %c0_23 = arith.constant 0 : index
    %39 = vector.load %arg8[%c0_22, %c0_23] : memref<8x2xf32, #tpu.memory_space<vmem>>, vector<8x2xf32>
    tpu.vector_store %arg8[%c0_22, %c0_23], %38 {strides = array<i32>} : memref<8x2xf32, #tpu.memory_space<vmem>>, vector<8x2xf32>,
    return
  }
  func.func @transform_0(%arg0: i32) -> (i32, i32) {
    %c0_i32 = arith.constant 0 : i32
    %c0_i32_0 = arith.constant 0 : i32
    return %arg0, %c0_i32 : i32, i32
  }
  func.func @transform_1(%arg0: i32) -> (i32, i32) {
    %c0_i32 = arith.constant 0 : i32
    %c0_i32_0 = arith.constant 0 : i32
    %c0_i32_1 = arith.constant 0 : i32
    return %c0_i32, %c0_i32_0 : i32, i32
  }
  func.func @transform_2(%arg0: i32) -> (i32, i32) {
    %c0_i32 = arith.constant 0 : i32
    %c0_i32_0 = arith.constant 0 : i32
    %c0_i32_1 = arith.constant 0 : i32
    return %c0_i32, %c0_i32_0 : i32, i32
  }
  func.func @transform_3(%arg0: i32) -> (i32, i32) {
    %c0_i32 = arith.constant 0 : i32
    %c0_i32_0 = arith.constant 0 : i32
    %c0_i32_1 = arith.constant 0 : i32
    return %c0_i32, %c0_i32_0 : i32, i32
  }
  func.func @transform_4(%arg0: i32) -> (i32, i32) {
    %c0_i32 = arith.constant 0 : i32
    %c0_i32_0 = arith.constant 0 : i32
    %c0_i32_1 = arith.constant 0 : i32
    return %c0_i32, %c0_i32_0 : i32, i32
  }
  func.func @transform_5(%arg0: i32) -> (i32, i32) {
    %c0_i32 = arith.constant 0 : i32
    %c0_i32_0 = arith.constant 0 : i32
    %c0_i32_1 = arith.constant 0 : i32
    return %c0_i32, %c0_i32_0 : i32, i32
  }
  func.func @transform_6(%arg0: i32) -> (i32, i32) {
    %c0_i32 = arith.constant 0 : i32
    %c0_i32_0 = arith.constant 0 : i32
    %c0_i32_1 = arith.constant 0 : i32
    return %c0_i32, %c0_i32_0 : i32, i32
  }
  func.func @transform_7(%arg0: i32) -> (i32, i32) {
    %c0_i32 = arith.constant 0 : i32
    %c0_i32_0 = arith.constant 0 : i32
    return %arg0, %c0_i32 : i32, i32
  }
}

</mosaic_0001>

<bundles_post_ra>
// kernel: _forward.1
= control target key start
LH: loop header
LB: loop body
LE: loop exit
PB: predicated region body
PF: predicated region fallthrough
CT: control target
= control target key end

     0   :  { %12 = vsyncpa [#allocation3], 0  ;;  %s838_s0 = inlined_call_operand.hbm [shape: f32[2,64], index: 0, kind: input, shape index: {}]   ;;  %s839_s1 = inlined_call_operand.hbm [shape: f32[64,128], index: 1, kind: input, shape index: {}]   ;;  %s840_s2 = inlined_call_operand.vmem [shape: f32[1,128], index: 2, kind: input, shape index: {}]   ;;  %s841_s3 = inlined_call_operand.hbm [shape: f32[128,128], index: 3, kind: input, shape index: {}]   ;;  %s842_s4 = inlined_call_operand.vmem [shape: f32[1,128], index: 4, kind: input, shape index: {}]   ;;  %s843_s5 = inlined_call_operand.hbm [shape: f32[128,128], index: 5, kind: input, shape index: {}]   ;;  %s844_s6 = inlined_call_operand.vmem [shape: f32[1,128], index: 6, kind: input, shape index: {}]   ;;  %s845_s7 = inlined_call_operand.vmem [shape: f32[8,2], index: 7, kind: output, shape index: {}]  }
   0x1   :  { %13 = vsyncpa [#allocation5], 0 }
   0x2   :  { %14 = vsyncpa [#allocation8], 0 }
   0x3   :  { %19 = vsyncadd [#allocation3], 96  ;;  %s688_s24 = smov [#allocation4]   ;;  %s594_s28 = scalar_lea.hbm %s839_s1, 1024 }
   0x4   :  { %s32_s25 = sshll.u32 %s688_s24, 4  ;;  %p595_p0 = scmp.ne.s32.totalorder %s839_s1, %s594_s28  ;;  %s33_s25 = int_to_ptr.vmem [resolvable:$true] %s32_s25 }
   0x5   :  { %p598_p1 = scmp.lt.u32.totalorder %s594_s28, %s839_s1 }
   0x7   :  { %p600_p2 = pnand %p598_p1, %p595_p0 }
   0x9   :  { %603 = shalt.err (!%p600_p2)
}
   0xa   :  { %s604_s10 = scalar_lea.vmem %s33_s25, 1024  ;;  %p609_p4 = scmp.lt.s32.totalorder %s33_s25, %s33_s25 }
   0xb   :  { %p605_p3 = scmp.ne.s32.totalorder %s33_s25, %s604_s10  ;;  %p610_p5 = scmp.lt.s32.totalorder %s604_s10, %s604_s10 }
   0xd   :  { %p611_p6 = por %p610_p5, %p609_p4 }
   0xf   :  { %p612_p7 = pnand %p611_p6, %p605_p3 }
  0x11   :  { %615 = shalt.err (!%p612_p7)
}
  0x12   :  { %s689_s11 = smov 128   ;;  %s690_s12 = smov 8  }
  0x13   :  { %38 = dma.hbm_to_vmem [thread:$0]  %s839_s1, 1024, %s33_s25, [#allocation5], %s689_s11, %s689_s11, %s690_s12  }
  0x14   :  { %s691_s15 = smov [#allocation2]   ;;  %s616_s19 = scalar_lea.hbm %s838_s0, 32 }
  0x15   :  { %s20_s16 = sshll.u32 %s691_s15, 4  ;;  %p617_p8 = scmp.ne.s32.totalorder %s838_s0, %s616_s19  ;;  %s21_s16 = int_to_ptr.vmem [resolvable:$true] %s20_s16 }
  0x16   :  { %p620_p9 = scmp.lt.u32.totalorder %s616_s19, %s838_s0 }
  0x18   :  { %p622_p10 = pnand %p620_p9, %p617_p8 }
  0x1a   :  { %625 = shalt.err (!%p622_p10)
}
  0x1b   :  { %s626_s24 = scalar_lea.vmem %s21_s16, 32  ;;  %s630_s1 = scalar_lea.vmem %s21_s16, 128 }
  0x1c   :  { %p627_p11 = scmp.ne.s32.totalorder %s21_s16, %s626_s24  ;;  %p631_p12 = scmp.lt.s32.totalorder %s21_s16, %s21_s16 }
  0x1d   :  { %p632_p13 = scmp.lt.s32.totalorder %s630_s1, %s626_s24 }
  0x1f   :  { %p633_p0 = por %p632_p13, %p631_p12 }
  0x21   :  { %p634_p1 = pnand %p633_p0, %p627_p11 }
  0x23   :  { %637 = shalt.err (!%p634_p1)
}
  0x24   :  { %s692_s25 = smov 32   ;;  %s693_s26 = smov 2  }
  0x25   :  { %26 = dma.hbm_to_vmem [thread:$0]  %s838_s0, 32, %s21_s16, [#allocation3], %s692_s25, %s692_s25, %s693_s26  }
  0x26   :  { %s694_s29 = smov [#allocation6]   ;;  %s695_s8 = smov [#allocation7]  }
  0x27   :  { %s46_s30 = sshll.u32 %s694_s29, 4  ;;  %s60_s9 = sshll.u32 %s695_s8, 4  ;;  %s47_s30 = int_to_ptr.vmem [resolvable:$true] %s46_s30  ;;  %s766_s9 = int_to_ptr.vmem [resolvable:$true] %s60_s9 }
  0x28   :  { %s638_s14 = scalar_lea.hbm %s841_s3, 2048 }
  0x29   :  { %p639_p2 = scmp.ne.s32.totalorder %s841_s3, %s638_s14  ;;  %p642_p3 = scmp.lt.u32.totalorder %s638_s14, %s841_s3 }
  0x2b   :  { %p644_p4 = pnand %p642_p3, %p639_p2 }
  0x2d   :  { %647 = shalt.err (!%p644_p4)
}
  0x2e   :  { %s648_s0 = scalar_lea.vmem %s47_s30, 2048  ;;  %p653_p6 = scmp.lt.s32.totalorder %s47_s30, %s47_s30 }
  0x2f   :  { %p649_p5 = scmp.ne.s32.totalorder %s47_s30, %s648_s0  ;;  %p654_p7 = scmp.lt.s32.totalorder %s648_s0, %s648_s0 }
  0x31   :  { %p655_p8 = por %p654_p7, %p653_p6 }
  0x33   :  { %p656_p9 = pnand %p655_p8, %p649_p5 }
  0x35   :  { %659 = shalt.err (!%p656_p9)
}
  0x36   :  { %52 = dma.hbm_to_vmem [thread:$0]  %s841_s3, 2048, %s47_s30, [#allocation5], %s689_s11, %s689_s11, %s690_s12  }
  0x37   :  { %s660_s23 = scalar_lea.hbm %s843_s5, 2048 }
  0x38   :  { %p661_p10 = scmp.ne.s32.totalorder %s843_s5, %s660_s23  ;;  %p664_p11 = scmp.lt.u32.totalorder %s660_s23, %s843_s5 }
  0x3a   :  { %p666_p12 = pnand %p664_p11, %p661_p10 }
  0x3c   :  { %669 = shalt.err (!%p666_p12)
}
  0x3d   :  { %s670_s27 = scalar_lea.vmem %s766_s9, 2048  ;;  %p675_p0 = scmp.lt.s32.totalorder %s766_s9, %s766_s9 }
  0x3e   :  { %p671_p13 = scmp.ne.s32.totalorder %s766_s9, %s670_s27  ;;  %p676_p1 = scmp.lt.s32.totalorder %s670_s27, %s670_s27 }
  0x40   :  { %p677_p2 = por %p676_p1, %p675_p0 }
  0x42   :  { %p678_p3 = pnand %p677_p2, %p671_p13 }
  0x44   :  { %681 = shalt.err (!%p678_p3)
}
  0x45   :  { %66 = dma.hbm_to_vmem [thread:$0]  %s843_s5, 2048, %s766_s9, [#allocation8], %s689_s11, %s689_s11, %s690_s12  }
  0x46   :  { %682 = dma.done.wait [#allocation3], 128  }
  0x47   :  { %683 = vsyncadd [#allocation3], 4294967168 }
  0x48   :  { %684 = dma.done.wait [#allocation5], 3072  }
  0x49   :  { %685 = vsyncadd [#allocation5], 4294964224 }
  0x4a   :  { %686 = dma.done.wait [#allocation8], 2048  }
  0x4b   :  { %687 = vsyncadd [#allocation8], 4294965248  ;;  %v696_v0 = vmov 0.0|0.0   ;;  %vm697_vm0 = vmmov 0   ;;  %v698_v1 = vmov 0.0   ;;  %v82_v2 = vld [vmem:[#allocation4] sm:$0xff] }
  0x4c   :  { %519 = vmatprep.subr.bf16.mxu0 %v696_v0  ;;  %446 = vmatprep.mubr.msk.f32.mxu0 %vm697_vm0, %v698_v1  ;;  %v83_v3 = vld [vmem:[#allocation4 + $0x8] sm:$0xff]  ;;  %v84_v4 = vld [vmem:[#allocation4 + $0x10] sm:$0xff]  ;;  %v85_v6 = vld [vmem:[#allocation4 + $0x18] sm:$0xff]  ;;  %vm97_vm1 = vcmask 523264   ;;  %vm374_vm3 = vcmask 15360  }
  0x4d   :  { %531 = vmatprep.subr.bf16.mxu1 %v696_v0  ;;  %481 = vmatprep.mubr.msk.f32.mxu1 %vm697_vm0, %v698_v1  ;;  %v520_v5 = vpack.c.bf16 %v83_v3, %v82_v2  ;;  %v523_v7 = vpack.c.bf16 %v85_v6, %v84_v4  ;;  %v172_v8 = vld [vmem:[#allocation6] sm:$0xff]  ;;  %v173_v9 = vld [vmem:[#allocation6 + $0x8] sm:$0xff]  ;;  %v174_v10 = vld [vmem:[#allocation6 + $0x10] sm:$0xff] }
  0x4e   :  { %v86_v11 = vld [vmem:[#allocation4 + $0x20] sm:$0xff]  ;;  %v87_v12 = vld [vmem:[#allocation4 + $0x28] sm:$0xff]  ;;  %v532_v13 = vpack.c.bf16 %v173_v9, %v172_v8  ;;  %v175_v14 = vld [vmem:[#allocation6 + $0x18] sm:$0xff]  ;;  %v359_v9 = vlaneseq }
  0x4f   :  { %521 = vmatpush3.bf16.msra.mxu0 %v520_v5  ;;  %v535_v15 = vpack.c.bf16 %v175_v14, %v174_v10  ;;  %v526_v16 = vpack.c.bf16 %v87_v12, %v86_v11  ;;  %v176_v17 = vld [vmem:[#allocation6 + $0x20] sm:$0xff]  ;;  %v177_v18 = vld [vmem:[#allocation6 + $0x28] sm:$0xff]  ;;  %v88_v19 = vld [vmem:[#allocation4 + $0x30] sm:$0xff] }
  0x50   :  { %522 = vmatprep.subr.bf16.mxu0 %v696_v0  ;;  %533 = vmatpush3.bf16.msra.mxu1 %v532_v13  ;;  %v89_v20 = vld [vmem:[#allocation4 + $0x38] sm:$0xff]  ;;  %v538_v21 = vpack.c.bf16 %v177_v18, %v176_v17  ;;  %v178_v23 = vld [vmem:[#allocation6 + $0x30] sm:$0xff]  ;;  %v180_v27 = vld [vmem:[#allocation6 + $0x40] sm:$0xff]  ;;  %v360_v10 = vand.u32 127, %v359_v9 }
  0x51   :  { %534 = vmatprep.subr.bf16.mxu1 %v696_v0  ;;  %v529_v22 = vpack.c.bf16 %v89_v20, %v88_v19  ;;  %v179_v24 = vld [vmem:[#allocation6 + $0x38] sm:$0xff]  ;;  %v181_v28 = vld [vmem:[#allocation6 + $0x48] sm:$0xff]  ;;  %v182_v30 = vld [vmem:[#allocation6 + $0x50] sm:$0xff] }
  0x52   :  { %v541_v25 = vpack.c.bf16 %v179_v24, %v178_v23  ;;  %v81_v26 = vld [vmem:[#allocation2] sm:$0xff]  ;;  %v544_v29 = vpack.c.bf16 %v181_v28, %v180_v27  ;;  %v184_v33 = vld [vmem:[#allocation6 + $0x60] sm:$0xff]  ;;  %v185_v34 = vld [vmem:[#allocation6 + $0x68] sm:$0xff]  ;;  %vm361_vm2 = vcmp.lt.s32.totalorder %v360_v10, 2 }
  0x53   :  { %524 = vmatpush3.bf16.msra.mxu0 %v523_v7  ;;  %v183_v31 = vld [vmem:[#allocation6 + $0x58] sm:$0xff]  ;;  %v550_v35 = vpack.c.bf16 %v185_v34, %v184_v33  ;;  %v186_v36 = vld [vmem:[#allocation6 + $0x70] sm:$0xff]  ;;  %v266_v39 = vld [vmem:[#allocation7] sm:$0xff] }
  0x54   :  { %525 = vmatprep.subr.bf16.mxu0 %v696_v0  ;;  %536 = vmatpush3.bf16.msra.mxu1 %v535_v15  ;;  %v547_v32 = vpack.c.bf16 %v183_v31, %v182_v30  ;;  %v187_v37 = vld [vmem:[#allocation6 + $0x78] sm:$0xff]  ;;  %v267_v40 = vld [vmem:[#allocation7 + $0x8] sm:$0xff]  ;;  %v268_v41 = vld [vmem:[#allocation7 + $0x10] sm:$0xff] }
  0x55   :  { %537 = vmatprep.subr.bf16.mxu1 %v696_v0  ;;  %v553_v38 = vpack.c.bf16 %v187_v37, %v186_v36  ;;  %v556_v42 = vpack.c.bf16 %v267_v40, %v266_v39  ;;  %v269_v43 = vld [vmem:[#allocation7 + $0x18] sm:$0xff]  ;;  %v270_v45 = vld [vmem:[#allocation7 + $0x20] sm:$0xff]  ;;  %v271_v46 = vld [vmem:[#allocation7 + $0x28] sm:$0xff] }
  0x56   :  { %v559_v44 = vpack.c.bf16 %v269_v43, %v268_v41  ;;  %v562_v47 = vpack.c.bf16 %v271_v46, %v270_v45  ;;  %v272_v48 = vld [vmem:[#allocation7 + $0x30] sm:$0xff]  ;;  %v273_v49 = vld [vmem:[#allocation7 + $0x38] sm:$0xff]  ;;  %v274_v51 = vld [vmem:[#allocation7 + $0x40] sm:$0xff] }
  0x57   :  { %527 = vmatpush3.bf16.msra.mxu0 %v526_v16  ;;  %v565_v50 = vpack.c.bf16 %v273_v49, %v272_v48  ;;  %v275_v52 = vld [vmem:[#allocation7 + $0x48] sm:$0xff]  ;;  %v276_v54 = vld [vmem:[#allocation7 + $0x50] sm:$0xff]  ;;  %v277_v55 = vld [vmem:[#allocation7 + $0x58] sm:$0xff] }
  0x58   :  { %528 = vmatprep.subr.bf16.mxu0 %v696_v0  ;;  %539 = vmatpush3.bf16.msra.mxu1 %v538_v21  ;;  %v568_v53 = vpack.c.bf16 %v275_v52, %v274_v51  ;;  %v571_v56 = vpack.c.bf16 %v277_v55, %v276_v54  ;;  %v278_v57 = vld [vmem:[#allocation7 + $0x60] sm:$0xff]  ;;  %v279_v58 = vld [vmem:[#allocation7 + $0x68] sm:$0xff]  ;;  %v383_v60 = vld [vmem:[%s840_s2] ss:$0 sm:$0xff] }
  0x59   :  { %540 = vmatprep.subr.bf16.mxu1 %v696_v0  ;;  %v574_v59 = vpack.c.bf16 %v279_v58, %v278_v57  ;;  %v280_v2 = vld [vmem:[#allocation7 + $0x70] sm:$0xff]  ;;  %v281_v3 = vld [vmem:[#allocation7 + $0x78] sm:$0xff] }
  0x5a   :  { %v577_v4 = vpack.c.bf16 %v281_v3, %v280_v2  ;;  %v385_v5 = vld [vmem:[%s842_s4] ss:$0 sm:$0xff] }
  0x5b   :  { %530 = vmatpush3.bf16.msra.mxu0 %v529_v22  ;;  %v386_v11 = vld [vmem:[%s844_s6] ss:$0 sm:$0xff] }
  0x5c   :  { %555 = vmatprep.subr.bf16.mxu0 %v696_v0  ;;  %542 = vmatpush3.bf16.msra.mxu1 %v541_v25 }
  0x5d   :  { %543 = vmatprep.subr.bf16.mxu1 %v696_v0 }
  0x5e   :  { %447 = vmatmul.mubr.msk.f32.vlgmr.msra.gmra.mrb[0].mxu0 %vm97_vm1, %v81_v26 }
  0x5f   :  { %516 = vmatprep.mubr.msk.f32.mxu0 %vm697_vm0, %v698_v1  ;;  %557 = vmatpush3.bf16.msra.mxu0 %v556_v42 }
  0x60   :  { %545 = vmatpush3.bf16.msra.mxu1 %v544_v29  ;;  %558 = vmatprep.subr.bf16.mxu0 %v696_v0 }
  0x61   :  { %546 = vmatprep.subr.bf16.mxu1 %v696_v0 }
  0x63   :  { %560 = vmatpush3.bf16.msra.mxu0 %v559_v44 }
  0x64   :  { %548 = vmatpush3.bf16.msra.mxu1 %v547_v32  ;;  %561 = vmatprep.subr.bf16.mxu0 %v696_v0 }
  0x65   :  { %549 = vmatprep.subr.bf16.mxu1 %v696_v0 }
  0x67   :  { %563 = vmatpush3.bf16.msra.mxu0 %v562_v47 }
  0x68   :  { %551 = vmatpush3.bf16.msra.mxu1 %v550_v35  ;;  %564 = vmatprep.subr.bf16.mxu0 %v696_v0 }
  0x69   :  { %552 = vmatprep.subr.bf16.mxu1 %v696_v0 }
  0x6b   :  { %566 = vmatpush3.bf16.msra.mxu0 %v565_v50 }
  0x6c   :  { %554 = vmatpush3.bf16.msra.mxu1 %v553_v38  ;;  %567 = vmatprep.subr.bf16.mxu0 %v696_v0 }
  0x6f   :  { %569 = vmatpush3.bf16.msra.mxu0 %v568_v53 }
  0x70   :  { %570 = vmatprep.subr.bf16.mxu0 %v696_v0 }
  0x73   :  { %572 = vmatpush3.bf16.msra.mxu0 %v571_v56 }
  0x74   :  { %573 = vmatprep.subr.bf16.mxu0 %v696_v0 }
  0x77   :  { %575 = vmatpush3.bf16.msra.mxu0 %v574_v59 }
  0x78   :  { %576 = vmatprep.subr.bf16.mxu0 %v696_v0 }
  0x7b   :  { %578 = vmatpush3.bf16.msra.mxu0 %v577_v4 }
 0x131   :  { %v167_v61 = vpop.f32.mrb[0].mxu0 }
 0x132   :  { %v168_v62 = vadd.f32 %v383_v60, %v167_v61  ;;  %v448_v63 = vpop.f32.mrb[1].mxu0 }
 0x134   :  { %v171_v1 = vmax.f32 %v168_v62, 0.0 }
 0x136   :  { %482 = vmatmul.mubr.f32.vlgmr.msra.gmra.mrb[0].mxu1 %v171_v1 }
 0x209   :  { %v261_v6 = vpop.f32.mrb[0].mxu1 }
 0x20a   :  { %v262_v7 = vadd.f32 %v385_v5, %v261_v6  ;;  %v483_v0 = vpop.f32.mrb[1].mxu1 }
 0x20c   :  { %v265_v8 = vmax.f32 %v262_v7, 0.0 }
 0x20e   :  { %517 = vmatmul.mubr.f32.vlgmr.msra.gmra.mrb[2].mxu0 %v265_v8 }
 0x2e1   :  { %v355_v12 = vpop.f32.mrb[2].mxu0 }
 0x2e2   :  { %v356_v13 = vadd.f32 %v386_v11, %v355_v12  ;;  %v518_v14 = vpop.f32.mrb[3].mxu0 }
 0x2e4   :  { %v362_v15 = vsel %vm361_vm2, %v356_v13, -3.4028235e+38 }
 0x2e5   :  { %363 = vmax.xlane.f32.xlu0 %v362_v15 }
 0x372   :  { %v364_v16 = vpop.xlane.xlu0 %363 }
 0x373   :  { %v365_v17 = vsub.f32 %v356_v13, %v364_v16 }
 0x375   :  { %v366_v18 = vmin.f32 %v365_v17, 0.0 }
 0x377   :  { %v367_v19 = vmul.f32 1.442695, %v366_v18 }
 0x379   :  { %590 = vpow2.f32 %v367_v19 }
 0x383   :  { %v591_v20 = vpop.eup %590 }
 0x384   :  { %v369_v21 = vsel %vm361_vm2, %v591_v20, 0.0 }
 0x385   :  { %370 = vadd.xlane.f32.xlu0 %v369_v21 }
 0x412   :  { %v371_v22 = vpop.xlane.xlu0 %370 }
 0x413   :  { %592 = vrcp.f32 %v371_v22 }
 0x41d   :  { %v593_v23 = vpop.eup %592 }
 0x41e   :  { %v373_v24 = vmul.f32 %v593_v23, %v369_v21 }
 0x420   :  { %375 = vst.msk [vmem:[%s845_s7] sm:$0xff] %vm374_vm3, %v373_v24 }
 0x421   :  { %380 = vsyncpa [#allocation3], 1 }
 0x422   :  { %381 = vsyncpa [#allocation5], 1 }
 0x423   :  { %382 = vsyncpa [#allocation8], 1 }

</bundles_post_ra>
